<compile_context>
chip_gen: v6e
topology: v6e:2x2x1
jax: 0.10.0
libtpu: 0.0.40
codegen_flags: <defaults>
</compile_context>

<pallas_src>
import jax
import jax.numpy as jnp
from jax.experimental import pallas as pl
from jax.experimental.pallas import tpu as pltpu


def _masked_ce_kernel(x_ref, t_ref, w_ref, m_ref, out_ref, num_acc, den_acc):
    i = pl.program_id(1)

    @pl.when(i == 0)
    def _init():
        num_acc[...] = jnp.zeros_like(num_acc)
        den_acc[...] = jnp.zeros_like(den_acc)

    x = x_ref[...].astype(jnp.float32)                          # (TM, C)
    mx = jnp.max(x, axis=-1, keepdims=True)                     # (TM, 1)
    lse = jnp.log(jnp.sum(jnp.exp(x - mx), axis=-1, keepdims=True)) + mx
    logp = x - lse                                              # log_softmax

    wy = w_ref[...].astype(jnp.float32) * t_ref[...].astype(jnp.float32)
    # Row-reduce FIRST: shrinks the masked select and the accumulator to (TM,1).
    row_ce = jnp.sum(wy * logp, axis=-1, keepdims=True)         # (TM, 1)

    msk = m_ref[...]                                            # (TM, 1) f32 {0,1}
    # `where` (select), NOT a multiply: rows of clamped / partial tiles may hold
    # garbage logits (Inf/NaN) and a multiply would propagate NaN into the sums.
    contrib = jnp.where(msk > 0.0, row_ce, 0.0)                 # (TM, 1)

    num_acc[...] += jnp.sum(contrib, axis=0, keepdims=True)     # (1, 1) partial
    den_acc[...] += jnp.sum(msk, axis=0, keepdims=True)         # (1, 1) partial

    @pl.when(i == pl.num_programs(1) - 1)
    def _finalize():
        loss_sum = -jnp.sum(num_acc[...])                       # masked CE sum
        cnt = jnp.sum(den_acc[...])                             # masked count
        lane = jax.lax.broadcasted_iota(jnp.int32, out_ref.shape, 2)
        out_ref[...] = jnp.where(lane == 0, loss_sum,
                                 jnp.where(lane == 1, cnt, 0.0))


def _device_kind():
    try:
        return jax.devices()[0].device_kind.lower()
    except Exception:
        return ""


def _tpu_vmem_bytes():
    try:
        return int(pltpu.get_tpu_info().vmem_capacity_bytes)
    except Exception:
        return 64 * 1024 * 1024        # v7x (smallest) as the conservative fallback


def _num_tensorcores(kind):
    # Only megacore generations (v4 / v7x) expose 2 TensorCores behind one JAX
    # device; v5e/v6e are single-TC.  Unknown -> 1 (always-safe codegen).
    if ("v4" in kind) or ("v7" in kind) or ("7x" in kind):
        return 2
    return 1


def masked_ce_loss(logits, target, mask, weight=None):
    """Pallas equivalent of Masked_CE_Loss(weight, reduction='mean')(input, target, mask)."""
    N, L, C = logits.shape
    # TODO(synk): tiled-C online-logsumexp path for very large class counts.
    assert C <= 8192, "class dim must fit a single VMEM block"
    if weight is None:
        weight = jnp.ones((C,), jnp.float32)
    w2 = jnp.asarray(weight, jnp.float32).reshape(1, C)

    M = N * L
    x = logits.reshape(M, C)          # native dtype, layout-free reshape
    t = target.reshape(M, C)

    # ---------------- chip-aware tile / VMEM budgeting ----------------------
    kind = _device_kind()
    n_cores = _num_tensorcores(kind)
    phys_vmem = _tpu_vmem_bytes()

    # Scoped-VMEM limit: half of physical, clamped to [32, 64] MiB
    # (-> 64 MiB on v5e/v6e's 128 MiB, 32 MiB on v7x's 64 MiB).
    vmem_limit = min(max(phys_vmem // 2, 32 * 1024 * 1024), 64 * 1024 * 1024)
    # Accounted budget ~60% of the limit (30-40% headroom for compiler scratch).
    budget = (vmem_limit * 3) // 5

    lane_c = ((C + 127) // 128) * 128              # VMEM lane padding of C
    sx = jnp.dtype(logits.dtype).itemsize
    st = jnp.dtype(target.dtype).itemsize
    per_row = (2 * lane_c * (sx + st)              # logits+target, double-buffered, native dtype
               + 4 * lane_c * 4                    # ~4 full-block f32 temporaries (x, logp, wy, prod)
               + 2 * 128 * 4)                      # (tm,1) f32 mask block lane-pads to 128, x2 buffers
    tm_cap = 1024 if "v5" in kind else 2048        # v5e: past the DMA-efficiency knee anyway
    tm = min(tm_cap, budget // per_row)
    tm = max(8, (tm // 8) * 8)
    tm = min(tm, ((M + 7) // 8) * 8)               # don't exceed (rounded-up) M

    g = pl.cdiv(M, tm)                             # row tiles covering the data
    n_split = min(n_cores, g)                      # leading (core) grid axis
    g2 = pl.cdiv(g, n_split)
    m_pad = n_split * g2 * tm
    g_last = g - 1

    # Only the tiny mask gets padded/copied on the host (zeros beyond M).
    # TODO(synk): lane-dense (1, tm) mask blocks + in-kernel relayout would save
    # the lane-padded VMEM; kept (tm, 1) here and accounted in the budget.
    mk = jnp.zeros((m_pad, 1), jnp.float32).at[:M, 0].set(
        mask.reshape(M).astype(jnp.float32))

    def stream_map(c, i):
        # Clamp so we never request a block fully outside (M, C); the
        # zero-padded mask nullifies any re-read rows via the in-kernel where.
        return (jnp.minimum(c * g2 + i, g_last), 0)

    if n_split > 1:
        # Real 2-TC split on megacore chips; each core owns one c value, runs
        # its own i==0 init / i==last finalize on per-core scratch, and writes
        # its own output block.  Fallback keeps plain PARALLEL if the enum is
        # missing in this JAX version.
        dim_sems = (getattr(pltpu, "CORE_PARALLEL", pltpu.PARALLEL), pltpu.ARBITRARY)
    else:
        dim_sems = ("arbitrary", "arbitrary")

    partials = pl.pallas_call(
        _masked_ce_kernel,
        out_shape=jax.ShapeDtypeStruct((n_split, 1, 128), jnp.float32),
        grid_spec=pltpu.PrefetchScalarGridSpec(
            num_scalar_prefetch=0,
            grid=(n_split, g2),
            in_specs=[
                pl.BlockSpec((tm, C), stream_map),                       # logits (native dtype)
                pl.BlockSpec((tm, C), stream_map),                       # target (native dtype)
                pl.BlockSpec((1, C), lambda c, i: (0, 0)),               # weight (VMEM-resident)
                pl.BlockSpec((tm, 1), lambda c, i: (c * g2 + i, 0)),     # mask
            ],
            out_specs=pl.BlockSpec((1, 1, 128), lambda c, i: (c, 0, 0)),
            scratch_shapes=[
                pltpu.VMEM((1, 1), jnp.float32),   # masked CE-sum partial
                pltpu.VMEM((1, 1), jnp.float32),   # mask-count partial
            ],
        ),
        compiler_params=pltpu.CompilerParams(
            dimension_semantics=dim_sems,
            vmem_limit_bytes=vmem_limit,
        ),
    )(x, t, w2, mk)

    num = partials[:, 0, 0].sum()
    den = partials[:, 0, 1].sum()
    # NOTE: den == 0 (all-false mask) yields NaN, matching the torch module.
    return num / den


def masked_ce_loss_ref(logits, target, mask, weight):
    logp = jax.nn.log_softmax(logits.astype(jnp.float32), axis=-1)
    ce = -jnp.sum(weight[None, None, :] * target.astype(jnp.float32) * logp, axis=-1)
    m = mask.astype(jnp.float32)
    return jnp.sum(ce * m) / jnp.sum(m)


if __name__ == "__main__":
    key = jax.random.PRNGKey(0)
    k1, k2, k3 = jax.random.split(key, 3)

    N, L, C = 2, 16, 3                                   # C matches default weight [1,1,1]
    weight = jnp.array([1.0, 1.0, 1.0], jnp.float32)

    logits = jax.random.normal(k1, (N, L, C), jnp.float32)
    target = jax.nn.softmax(jax.random.normal(k2, (N, L, C), jnp.float32), axis=-1)
    mask = jax.random.bernoulli(k3, 0.5, (N, L))

    out = masked_ce_loss(logits, target, mask, weight)
    out = jax.block_until_ready(out)

    ref = masked_ce_loss_ref(logits, target, mask, weight)
    assert jnp.allclose(out, ref, rtol=1e-5, atol=1e-5), (out, ref)

    print("KERNEL_OK")
</pallas_src>

<mosaic_0001>
module attributes {stable_mosaic.version = 11 : i64} {
  func.func @_masked_ce_kernel(%arg0: i32, %arg1: i32, %arg2: memref<32x3xf32, #tpu.memory_space<vmem>>, %arg3: memref<32x3xf32, #tpu.memory_space<vmem>>, %arg4: memref<1x3xf32, #tpu.memory_space<vmem>>, %arg5: memref<32x1xf32, #tpu.memory_space<vmem>>, %arg6: memref<1x1x128xf32, #tpu.memory_space<vmem>>, %arg7: memref<1x1xf32, #tpu.memory_space<vmem>>, %arg8: memref<1x1xf32, #tpu.memory_space<vmem>>) attributes {dimension_semantics = [#tpu.dimension_semantics<arbitrary>, #tpu.dimension_semantics<arbitrary>], iteration_bounds = array<i64: 1, 1>, scalar_prefetch = 0 : i64, scratch_operands = 2 : i64, tpu.core_type = #tpu.core_type<tc>, window_params = [{transform_indices = @transform_0, window_bounds = array<i64: 32, 3>}, {transform_indices = @transform_1, window_bounds = array<i64: 32, 3>}, {pipeline_mode = #tpu.pipeline_mode<synchronous>, transform_indices = @transform_2, window_bounds = array<i64: 1, 3>}, {transform_indices = @transform_3, window_bounds = array<i64: 32, 1>}, {transform_indices = @transform_4, window_bounds = array<i64: 1, 1, 128>}]} {
    %c0_i32 = arith.constant 0 : i32
    %0 = arith.cmpi eq, %arg1, %c0_i32 : i32
    %1 = arith.extui %0 : i1 to i32
    %c0_i32_0 = arith.constant 0 : i32
    %2 = arith.cmpi ne, %1, %c0_i32_0 : i32
    scf.if %2 {
      %cst_24 = arith.constant 0.000000e+00 : f32
      %40 = vector.broadcast %cst_24 : f32 to vector<1x1xf32>
      %c0_25 = arith.constant 0 : index
      %c0_26 = arith.constant 0 : index
      %41 = vector.load %arg7[%c0_25, %c0_26] : memref<1x1xf32, #tpu.memory_space<vmem>>, vector<1x1xf32>
      tpu.vector_store %arg7[%c0_25, %c0_26], %40 {strides = array<i32>} : memref<1x1xf32, #tpu.memory_space<vmem>>, vector<1x1xf32>,
      %cst_27 = arith.constant 0.000000e+00 : f32
      %42 = vector.broadcast %cst_27 : f32 to vector<1x1xf32>
      %c0_28 = arith.constant 0 : index
      %c0_29 = arith.constant 0 : index
      %43 = vector.load %arg8[%c0_28, %c0_29] : memref<1x1xf32, #tpu.memory_space<vmem>>, vector<1x1xf32>
      tpu.vector_store %arg8[%c0_28, %c0_29], %42 {strides = array<i32>} : memref<1x1xf32, #tpu.memory_space<vmem>>, vector<1x1xf32>,
    } else {
    }
    %c0 = arith.constant 0 : index
    %c0_1 = arith.constant 0 : index
    %3 = vector.load %arg2[%c0, %c0_1] : memref<32x3xf32, #tpu.memory_space<vmem>>, vector<32x3xf32>
    %cst = arith.constant dense<0xFF800000> : vector<32xf32>
    %4 = vector.multi_reduction <maximumf>, %3, %cst [1] : vector<32x3xf32> to vector<32xf32>
    %5 = vector.shape_cast %4 : vector<32xf32> to vector<32x1xf32>
    %6 = vector.broadcast %5 : vector<32x1xf32> to vector<32x3xf32>
    %7 = arith.subf %3, %6 : vector<32x3xf32>
    %8 = math.exp %7 : vector<32x3xf32>
    %cst_2 = arith.constant dense<0.000000e+00> : vector<32xf32>
    %9 = vector.multi_reduction <add>, %8, %cst_2 [1] : vector<32x3xf32> to vector<32xf32>
    %10 = vector.shape_cast %9 : vector<32xf32> to vector<32x1xf32>
    %11 = math.log %10 : vector<32x1xf32>
    %12 = arith.addf %11, %5 : vector<32x1xf32>
    %13 = vector.broadcast %12 : vector<32x1xf32> to vector<32x3xf32>
    %14 = arith.subf %3, %13 : vector<32x3xf32>
    %c0_3 = arith.constant 0 : index
    %c0_4 = arith.constant 0 : index
    %15 = vector.load %arg4[%c0_3, %c0_4] : memref<1x3xf32, #tpu.memory_space<vmem>>, vector<1x3xf32>
    %c0_5 = arith.constant 0 : index
    %c0_6 = arith.constant 0 : index
    %16 = vector.load %arg3[%c0_5, %c0_6] : memref<32x3xf32, #tpu.memory_space<vmem>>, vector<32x3xf32>
    %17 = vector.broadcast %15 : vector<1x3xf32> to vector<32x3xf32>
    %18 = arith.mulf %17, %16 : vector<32x3xf32>
    %19 = arith.mulf %18, %14 : vector<32x3xf32>
    %cst_7 = arith.constant dense<0.000000e+00> : vector<32xf32>
    %20 = vector.multi_reduction <add>, %19, %cst_7 [1] : vector<32x3xf32> to vector<32xf32>
    %21 = vector.shape_cast %20 : vector<32xf32> to vector<32x1xf32>
    %c0_8 = arith.constant 0 : index
    %c0_9 = arith.constant 0 : index
    %22 = vector.load %arg5[%c0_8, %c0_9] : memref<32x1xf32, #tpu.memory_space<vmem>>, vector<32x1xf32>
    %cst_10 = arith.constant 0.000000e+00 : f32
    %23 = vector.broadcast %cst_10 : f32 to vector<32x1xf32>
    %24 = arith.cmpf ogt, %22, %23 : vector<32x1xf32>
    %cst_11 = arith.constant 0.000000e+00 : f32
    %25 = vector.broadcast %cst_11 : f32 to vector<32x1xf32>
    %26 = arith.select %24, %21, %25 : vector<32x1xi1>, vector<32x1xf32>
    %c0_12 = arith.constant 0 : index
    %c0_13 = arith.constant 0 : index
    %27 = vector.load %arg7[%c0_12, %c0_13] : memref<1x1xf32, #tpu.memory_space<vmem>>, vector<1x1xf32>
    %cst_14 = arith.constant dense<0.000000e+00> : vector<1xf32>
    %28 = vector.multi_reduction <add>, %26, %cst_14 [0] : vector<32x1xf32> to vector<1xf32>
    %29 = vector.shape_cast %28 : vector<1xf32> to vector<1x1xf32>
    %30 = arith.addf %27, %29 : vector<1x1xf32>
    %c0_15 = arith.constant 0 : index
    %c0_16 = arith.constant 0 : index
    %31 = vector.load %arg7[%c0_15, %c0_16] : memref<1x1xf32, #tpu.memory_space<vmem>>, vector<1x1xf32>
    tpu.vector_store %arg7[%c0_15, %c0_16], %30 {strides = array<i32>} : memref<1x1xf32, #tpu.memory_space<vmem>>, vector<1x1xf32>,
    %c0_17 = arith.constant 0 : index
    %c0_18 = arith.constant 0 : index
    %32 = vector.load %arg8[%c0_17, %c0_18] : memref<1x1xf32, #tpu.memory_space<vmem>>, vector<1x1xf32>
    %cst_19 = arith.constant dense<0.000000e+00> : vector<1xf32>
    %33 = vector.multi_reduction <add>, %22, %cst_19 [0] : vector<32x1xf32> to vector<1xf32>
    %34 = vector.shape_cast %33 : vector<1xf32> to vector<1x1xf32>
    %35 = arith.addf %32, %34 : vector<1x1xf32>
    %c0_20 = arith.constant 0 : index
    %c0_21 = arith.constant 0 : index
    %36 = vector.load %arg8[%c0_20, %c0_21] : memref<1x1xf32, #tpu.memory_space<vmem>>, vector<1x1xf32>
    tpu.vector_store %arg8[%c0_20, %c0_21], %35 {strides = array<i32>} : memref<1x1xf32, #tpu.memory_space<vmem>>, vector<1x1xf32>,
    %c0_i32_22 = arith.constant 0 : i32
    %37 = arith.cmpi eq, %arg1, %c0_i32_22 : i32
    %38 = arith.extui %37 : i1 to i32
    %c0_i32_23 = arith.constant 0 : i32
    %39 = arith.cmpi ne, %38, %c0_i32_23 : i32
    scf.if %39 {
      %c0_24 = arith.constant 0 : index
      %c0_25 = arith.constant 0 : index
      %40 = vector.load %arg7[%c0_24, %c0_25] : memref<1x1xf32, #tpu.memory_space<vmem>>, vector<1x1xf32>
      %41 = vector.shape_cast %40 : vector<1x1xf32> to vector<1x1x1xf32>
      %cst_26 = arith.constant dense<0.000000e+00> : vector<1xf32>
      %42 = vector.multi_reduction <add>, %41, %cst_26 [1, 2] : vector<1x1x1xf32> to vector<1xf32>
      %43 = vector.shape_cast %42 : vector<1xf32> to vector<1x1x1xf32>
      %44 = vector.extract %43[0, 0, 0] : f32 from vector<1x1x1xf32>
      %cst_27 = arith.constant 0.000000e+00 : f32
      %45 = arith.subf %cst_27, %44 : f32
      %c0_28 = arith.constant 0 : index
      %c0_29 = arith.constant 0 : index
      %46 = vector.load %arg8[%c0_28, %c0_29] : memref<1x1xf32, #tpu.memory_space<vmem>>, vector<1x1xf32>
      %47 = vector.shape_cast %46 : vector<1x1xf32> to vector<1x1x1xf32>
      %cst_30 = arith.constant dense<0.000000e+00> : vector<1xf32>
      %48 = vector.multi_reduction <add>, %47, %cst_30 [1, 2] : vector<1x1x1xf32> to vector<1xf32>
      %49 = vector.shape_cast %48 : vector<1xf32> to vector<1x1x1xf32>
      %50 = vector.extract %49[0, 0, 0] : f32 from vector<1x1x1xf32>
      %51 = tpu.iota {dimensions = array<i32: 2>} : vector<1x1x128xi32>
      %c0_i32_31 = arith.constant 0 : i32
      %52 = vector.broadcast %c0_i32_31 : i32 to vector<1x1x128xi32>
      %53 = arith.cmpi eq, %51, %52 : vector<1x1x128xi32>
      %c1_i32 = arith.constant 1 : i32
      %54 = vector.broadcast %c1_i32 : i32 to vector<1x1x128xi32>
      %55 = arith.cmpi eq, %51, %54 : vector<1x1x128xi32>
      %cst_32 = arith.constant 0.000000e+00 : f32
      %56 = vector.broadcast %50 : f32 to vector<1x1x128xf32>
      %57 = vector.broadcast %cst_32 : f32 to vector<1x1x128xf32>
      %58 = arith.select %55, %56, %57 : vector<1x1x128xi1>, vector<1x1x128xf32>
      %59 = vector.broadcast %45 : f32 to vector<1x1x128xf32>
      %60 = arith.select %53, %59, %58 : vector<1x1x128xi1>, vector<1x1x128xf32>
      %c0_33 = arith.constant 0 : index
      %c0_34 = arith.constant 0 : index
      %c0_35 = arith.constant 0 : index
      %61 = vector.load %arg6[%c0_33, %c0_34, %c0_35] : memref<1x1x128xf32, #tpu.memory_space<vmem>>, vector<1x1x128xf32>
      tpu.vector_store %arg6[%c0_33, %c0_34, %c0_35], %60 {strides = array<i32>} : memref<1x1x128xf32, #tpu.memory_space<vmem>>, vector<1x1x128xf32>,
    } else {
    }
    return
  }
  func.func @transform_0(%arg0: i32, %arg1: i32) -> (i32, i32) {
    %c1_i32 = arith.constant 1 : i32
    %0 = arith.muli %arg0, %c1_i32 : i32
    %1 = arith.addi %0, %arg1 : i32
    %c0_i32 = arith.constant 0 : i32
    %2 = arith.minsi %1, %c0_i32 : i32
    %c0_i32_0 = arith.constant 0 : i32
    %c0_i32_1 = arith.constant 0 : i32
    return %2, %c0_i32_0 : i32, i32
  }
  func.func @transform_1(%arg0: i32, %arg1: i32) -> (i32, i32) {
    %c1_i32 = arith.constant 1 : i32
    %0 = arith.muli %arg0, %c1_i32 : i32
    %1 = arith.addi %0, %arg1 : i32
    %c0_i32 = arith.constant 0 : i32
    %2 = arith.minsi %1, %c0_i32 : i32
    %c0_i32_0 = arith.constant 0 : i32
    %c0_i32_1 = arith.constant 0 : i32
    return %2, %c0_i32_0 : i32, i32
  }
  func.func @transform_2(%arg0: i32, %arg1: i32) -> (i32, i32) {
    %c0_i32 = arith.constant 0 : i32
    %c0_i32_0 = arith.constant 0 : i32
    %c0_i32_1 = arith.constant 0 : i32
    return %c0_i32, %c0_i32_0 : i32, i32
  }
  func.func @transform_3(%arg0: i32, %arg1: i32) -> (i32, i32) {
    %c1_i32 = arith.constant 1 : i32
    %0 = arith.muli %arg0, %c1_i32 : i32
    %1 = arith.addi %0, %arg1 : i32
    %c0_i32 = arith.constant 0 : i32
    %c0_i32_0 = arith.constant 0 : i32
    return %1, %c0_i32 : i32, i32
  }
  func.func @transform_4(%arg0: i32, %arg1: i32) -> (i32, i32, i32) {
    %c0_i32 = arith.constant 0 : i32
    %c0_i32_0 = arith.constant 0 : i32
    %c0_i32_1 = arith.constant 0 : i32
    return %arg0, %c0_i32, %c0_i32_0 : i32, i32, i32
  }
}

</mosaic_0001>

<bundles_post_ra>
// kernel: tpu_custom_call.1
= control target key start
LH: loop header
LB: loop body
LE: loop exit
PB: predicated region body
PF: predicated region fallthrough
CT: control target
= control target key end

     0   :  { %vm115_vm0 = vcmask 23552   ;;  %s454_s0 = inlined_call_operand.vmem [shape: f32[32,3], index: 0, kind: input, shape index: {}]   ;;  %s455_s1 = inlined_call_operand.vmem [shape: f32[32,3], index: 1, kind: input, shape index: {}]   ;;  %s456_s2 = inlined_call_operand.vmem [shape: f32[1,3], index: 2, kind: input, shape index: {}]   ;;  %s457_s3 = inlined_call_operand.vmem [shape: f32[32,1], index: 3, kind: input, shape index: {}]   ;;  %s458_s4 = inlined_call_operand.hbm [shape: f32[1,1,128], index: 4, kind: output, shape index: {}]  }
   0x1   :  { %v371_v0 = vld [vmem:[%s454_s0] sm:$0xff]  ;;  %v376_v1 = vld [vmem:[%s454_s0 + $0x10] sm:$0xff]  ;;  %v381_v2 = vld [vmem:[%s454_s0 + $0x8] sm:$0xff] }
   0x2   :  { %v116_v3 = vsel %vm115_vm0, %v371_v0, -inf  ;;  %v122_v4 = vsel %vm115_vm0, %v376_v1, -inf  ;;  %v390_v5 = vld [vmem:[%s454_s0 + $0x18] sm:$0xff] }
   0x3   :  { %9 = vsyncpa [#allocation5], 0  ;;  %117 = vmax.xlane.f32.xlu0 %v116_v3  ;;  %123 = vmax.xlane.f32.xlu1 %v122_v4  ;;  %v119_v6 = vsel %vm115_vm0, %v381_v2, -inf  ;;  %v125_v7 = vsel %vm115_vm0, %v390_v5, -inf  ;;  %v296_v33 = vld [vmem:[%s456_s2] ss:$0 sm:$0xff] }
   0x4   :  { %v169_v34 = vld [vmem:[%s455_s1] sm:$0xff]  ;;  %v170_v39 = vld [vmem:[%s455_s1 + $0x8] sm:$0xff]  ;;  %v171_v43 = vld [vmem:[%s455_s1 + $0x10] sm:$0xff]  ;;  %vm212_vm1 = vcmask 7168   ;;  %vm108_vm2 = vcmask 0   ;;  %s342_s12 = smov [#allocation4]  }
   0x5   :  { %v179_v37 = vmul.f32 %v296_v33, %v169_v34  ;;  %v180_v47 = vmul.f32 %v296_v33, %v170_v39  ;;  %v181_v50 = vmul.f32 %v296_v33, %v171_v43  ;;  %v172_v51 = vld [vmem:[%s455_s1 + $0x18] sm:$0xff]  ;;  %v200_v3 = vld [vmem:[%s457_s3 + $0x8] sm:$0xff]  ;;  %s270_s13 = sshll.u32 %s342_s12, 4  ;;  %s271_s13 = int_to_ptr.vmem [resolvable:$true] %s270_s13 }
   0x6   :  { %v182_v58 = vmul.f32 %v296_v33, %v172_v51  ;;  %v231_v4 = vsel %vm212_vm1, %v200_v3, 0.0  ;;  %vm204_vm4 = vcmp.gt.f32.partialorder %v200_v3, 0.0  ;;  %s319_s16 = scalar_lea.vmem %s271_s13, 16  ;;  %s323_s17 = scalar_lea.vmem %s271_s13, 32 }
   0x7   :  { %120 = vmax.xlane.f32.xlu0 %v119_v6  ;;  %126 = vmax.xlane.f32.xlu1 %v125_v7  ;;  %v201_v6 = vld [vmem:[%s457_s3 + $0x10] sm:$0xff]  ;;  %p320_p0 = scmp.ne.s32.totalorder %s271_s13, %s319_s16  ;;  %p324_p1 = scmp.lt.s32.totalorder %s271_s13, %s271_s13 }
   0x8   :  { %v233_v7 = vsel %vm212_vm1, %v201_v6, 0.0  ;;  %vm205_vm5 = vcmp.gt.f32.partialorder %v201_v6, 0.0  ;;  %p325_p2 = scmp.lt.s32.totalorder %s323_s17, %s319_s16 }
   0xa   :  { %p326_p3 = por %p325_p2, %p324_p1 }
   0xc   :  { %p327_p4 = pnand %p326_p3, %p320_p0 }
  0x8c   :  { %v118_v8 = vpop.xlane.xlu0 %117  ;;  %v124_v9 = vpop.xlane.xlu1 %123 }
  0x8d   :  { %v128_v10 = vsub.f32 %v371_v0, %v118_v8  ;;  %v130_v11 = vsub.f32 %v376_v1, %v124_v9 }
  0x8f   :  { %v132_v12 = vmul.f32 1.442695, %v128_v10  ;;  %v136_v13 = vmul.f32 1.442695, %v130_v11 }
  0x90   :  { %v121_v14 = vpop.xlane.xlu0 %120  ;;  %v127_v15 = vpop.xlane.xlu1 %126 }
  0x91   :  { %303 = vpow2.f32 %v132_v12  ;;  %v129_v16 = vsub.f32 %v381_v2, %v121_v14  ;;  %v131_v17 = vsub.f32 %v390_v5, %v127_v15  ;;  %v341_v12 = vmov 0.0  }
  0x92   :  { %305 = vpow2.f32 %v136_v13  ;;  %109 = vst.msk [vmem:[#allocation2] sm:$0x1] %vm108_vm2, %v341_v12  ;;  %110 = vst.msk [vmem:[#allocation3] sm:$0x1] %vm108_vm2, %v341_v12 }
  0x93   :  { %v134_v18 = vmul.f32 1.442695, %v129_v16  ;;  %v138_v19 = vmul.f32 1.442695, %v131_v17 }
  0x95   :  { %307 = vpow2.f32 %v134_v18 }
  0x96   :  { %309 = vpow2.f32 %v138_v19 }
  0x99   :  { %v229_v19 = vld [vmem:[#allocation3] sm:$0x1] }
  0x9e   :  { %v304_v20 = vpop.eup %303 }
  0x9f   :  { %v306_v21 = vpop.eup %305  ;;  %v140_v22 = vsel %vm115_vm0, %v304_v20, 0.0 }
  0xa0   :  { %141 = vadd.xlane.f32.xlu0 %v140_v22  ;;  %v146_v23 = vsel %vm115_vm0, %v306_v21, 0.0 }
  0xa2   :  { %v308_v24 = vpop.eup %307 }
  0xa3   :  { %v310_v25 = vpop.eup %309  ;;  %v143_v26 = vsel %vm115_vm0, %v308_v24, 0.0 }
  0xa4   :  { %147 = vadd.xlane.f32.xlu0 %v146_v23  ;;  %144 = vadd.xlane.f32.xlu1 %v143_v26  ;;  %v149_v27 = vsel %vm115_vm0, %v310_v25, 0.0 }
  0xa8   :  { %150 = vadd.xlane.f32.xlu1 %v149_v27 }
 0x129   :  { %v142_v28 = vpop.xlane.xlu0 %141 }
 0x12a   :  { %311 = vlog2.f32 %v142_v28 }
 0x12d   :  { %v145_v29 = vpop.xlane.xlu1 %144  ;;  %v148_v30 = vpop.xlane.xlu0 %147 }
 0x12e   :  { %313 = vlog2.f32 %v145_v29 }
 0x12f   :  { %315 = vlog2.f32 %v148_v30 }
 0x131   :  { %v151_v31 = vpop.xlane.xlu1 %150 }
 0x132   :  { %317 = vlog2.f32 %v151_v31 }
 0x137   :  { %v312_v32 = vpop.eup %311 }
 0x138   :  { %v153_v35 = vmul.f32 0.6931472, %v312_v32 }
 0x13a   :  { %v160_v36 = vadd.f32 %v153_v35, %v118_v8 }
 0x13b   :  { %v314_v38 = vpop.eup %313 }
 0x13c   :  { %v316_v40 = vpop.eup %315  ;;  %v155_v41 = vmul.f32 0.6931472, %v314_v38  ;;  %v164_v42 = vsub.f32 %v371_v0, %v160_v36 }
 0x13d   :  { %v157_v44 = vmul.f32 0.6931472, %v316_v40 }
 0x13e   :  { %v161_v45 = vadd.f32 %v155_v41, %v121_v14  ;;  %v183_v46 = vmul.f32 %v179_v37, %v164_v42  ;;  %v211_v41 = vld [vmem:[#allocation2] sm:$0x1] }
 0x13f   :  { %v318_v48 = vpop.eup %317  ;;  %v162_v49 = vadd.f32 %v157_v44, %v124_v9  ;;  %v202_v9 = vld [vmem:[%s457_s3 + $0x18] sm:$0xff] }
 0x140   :  { %v159_v52 = vmul.f32 0.6931472, %v318_v48  ;;  %v187_v53 = vsel %vm115_vm0, %v183_v46, 0.0  ;;  %v165_v54 = vsub.f32 %v381_v2, %v161_v45  ;;  %v235_v10 = vsel %vm212_vm1, %v202_v9, 0.0 }
 0x141   :  { %188 = vadd.xlane.f32.xlu0 %v187_v53  ;;  %v166_v55 = vsub.f32 %v376_v1, %v162_v49  ;;  %v199_v1 = vld [vmem:[%s457_s3] sm:$0xff]  ;;  %vm206_vm6 = vcmp.gt.f32.partialorder %v202_v9, 0.0  ;;  %v255_v46 = vlaneseq }
 0x142   :  { %v163_v56 = vadd.f32 %v159_v52, %v127_v15  ;;  %v184_v57 = vmul.f32 %v180_v47, %v165_v54  ;;  %v230_v2 = vsel %vm212_vm1, %v199_v1, 0.0  ;;  %vm203_vm3 = vcmp.gt.f32.partialorder %v199_v1, 0.0 }
 0x143   :  { %v185_v59 = vmul.f32 %v181_v50, %v166_v55  ;;  %v256_v47 = vand.u32 127, %v255_v46 }
 0x144   :  { %v190_v60 = vsel %vm115_vm0, %v184_v57, 0.0  ;;  %v167_v61 = vsub.f32 %v390_v5, %v163_v56  ;;  %v232_v5 = vadd.f32 %v231_v4, %v230_v2 }
 0x145   :  { %191 = vadd.xlane.f32.xlu1 %v190_v60  ;;  %v193_v62 = vsel %vm115_vm0, %v185_v59, 0.0  ;;  %vm258_vm7 = vcmp.eq.s32.totalorder %v256_v47, 1  ;;  %vm257_vm8 = vcmp.eq.s32.totalorder %v256_v47, 0 }
 0x146   :  { %194 = vadd.xlane.f32.xlu0 %v193_v62  ;;  %v186_v63 = vmul.f32 %v182_v58, %v167_v61  ;;  %v234_v8 = vadd.f32 %v233_v7, %v232_v5 }
 0x148   :  { %v196_v0 = vsel %vm115_vm0, %v186_v63, 0.0  ;;  %v236_v11 = vadd.f32 %v235_v10, %v234_v8 }
 0x149   :  { %197 = vadd.xlane.f32.xlu1 %v196_v0 }
 0x14a   :  { %v237_v13 = vrot.slane %v236_v11, 4 }
 0x14c   :  { %v238_v14 = vadd.f32 %v237_v13, %v236_v11 }
 0x14e   :  { %v239_v15 = vrot.slane %v238_v14, 2 }
 0x150   :  { %v240_v16 = vadd.f32 %v239_v15, %v238_v14 }
 0x152   :  { %v241_v17 = vrot.slane %v240_v16, 1 }
 0x154   :  { %v242_v18 = vadd.f32 %v241_v17, %v240_v16 }
 0x156   :  { %v243_v20 = vadd.f32 %v242_v18, %v229_v19 }
 0x158   :  { %244 = vst.msk [vmem:[#allocation3] sm:$0x1] %vm108_vm2, %v243_v20 }
 0x15f   :  { %v252_v44 = vld [vmem:[#allocation3] sm:$0x1] }
 0x1ca   :  { %v189_v21 = vpop.xlane.xlu0 %188 }
 0x1cb   :  { %v207_v22 = vsel %vm203_vm3, %v189_v21, 0.0 }
 0x1cc   :  { %v213_v26 = vsel %vm212_vm1, %v207_v22, 0.0 }
 0x1ce   :  { %v192_v23 = vpop.xlane.xlu1 %191 }
 0x1cf   :  { %v208_v24 = vsel %vm204_vm4, %v192_v23, 0.0  ;;  %v195_v25 = vpop.xlane.xlu0 %194 }
 0x1d0   :  { %v214_v27 = vsel %vm212_vm1, %v208_v24, 0.0  ;;  %v209_v28 = vsel %vm205_vm5, %v195_v25, 0.0 }
 0x1d1   :  { %v215_v29 = vadd.f32 %v214_v27, %v213_v26  ;;  %v216_v30 = vsel %vm212_vm1, %v209_v28, 0.0 }
 0x1d2   :  { %v198_v31 = vpop.xlane.xlu1 %197 }
 0x1d3   :  { %v217_v32 = vadd.f32 %v216_v30, %v215_v29  ;;  %v210_v33 = vsel %vm206_vm6, %v198_v31, 0.0 }
 0x1d4   :  { %v218_v34 = vsel %vm212_vm1, %v210_v33, 0.0 }
 0x1d5   :  { %v219_v35 = vadd.f32 %v218_v34, %v217_v32 }
 0x1d7   :  { %v220_v36 = vrot.slane %v219_v35, 4 }
 0x1d9   :  { %v221_v37 = vadd.f32 %v220_v36, %v219_v35 }
 0x1db   :  { %v222_v38 = vrot.slane %v221_v37, 2 }
 0x1dd   :  { %v223_v39 = vadd.f32 %v222_v38, %v221_v37 }
 0x1df   :  { %v224_v40 = vrot.slane %v223_v39, 1 }
 0x1e1   :  { %v225_v42 = vadd.f32 %v224_v40, %v223_v39 }
 0x1e3   :  { %v226_v43 = vadd.f32 %v225_v42, %v211_v41 }
 0x1e5   :  { %228 = vst.msk [vmem:[#allocation2] sm:$0x1] %vm108_vm2, %v226_v43 }
 0x1ec   :  { %v248_v45 = vld [vmem:[#allocation2] sm:$0x1] }
 0x1ed   :  { %297 = vpush %v248_v45 }
 0x1ee   :  { %299 = vpush %v252_v44 }
 0x21e   :  { %s298_s3 = spop %297 }
 0x21f   :  { %s251_s14 = ssub.f32 0.0, %s298_s3  ;;  %s300_s15 = spop %299 }
 0x220   :  { %v259_v48 = vstv %s300_s15 }
 0x221   :  { %v261_v49 = vstv %s251_s14  ;;  %v260_v50 = vsel %vm258_vm7, %v259_v48, 0.0 }
 0x222   :  { %v262_v51 = vsel %vm257_vm8, %v261_v49, %v260_v50 }
 0x223   :  { %263 = vst [vmem:[#allocation4] sm:$0x1] %v262_v51 }
 0x224   :  { %330 = shalt.err (!%p327_p4)
}
 0x225   :  { %273 = dma.vmem_to_hbm [thread:$0]  %s271_s13, 16, %s458_s4, [#allocation5]  }
 0x226   :  { %339 = dma.done.wait [#allocation5], 16  }
 0x227   :  { %340 = vsyncadd [#allocation5], 4294967280 }
 0x228   :  { %277 = vsyncpa [#allocation5], 1 }

</bundles_post_ra>
